<compile_context>
chip_gen: v6e
topology: v6e:2x2x1
jax: 0.10.0
libtpu: 0.0.40
codegen_flags: <defaults>
</compile_context>

<pallas_src>
import functools

import jax
import jax.numpy as jnp
from jax.experimental import pallas as pl
from jax.experimental.pallas import tpu as pltpu


def _round_up(x, m):
    return ((x + m - 1) // m) * m


def _make_ouffn_kernel(dims):
    """Fused OUFFN kernel for layer sizes `dims` (e.g. [4, 4, 4, 4, 1]).

    Layout: activations are (F, S, 128) slabs -- batch rides both the sublane
    and lane axes, so every vreg is fully dense.  Each layer is f_out unrolled
    broadcast multiply-adds; weights/biases are scalar reads from the packed
    SMEM parameter blob.
    """
    n_layers = len(dims) - 1
    w_offs, b_offs = [], []
    off = 0
    for fin, fout in zip(dims[:-1], dims[1:]):
        w_offs.append(off)
        b_offs.append(off + fin * fout)
        off += fin * fout + fout

    def kernel(p_ref, x_ref, out_ref):
        # p_ref: (n_params,) f32 SMEM; x_ref: (F, S, 128); out_ref: (S, 128)
        h = [x_ref[i].astype(jnp.float32) for i in range(dims[0])]
        for l in range(n_layers):
            fin, fout = dims[l], dims[l + 1]
            w0, b0 = w_offs[l], b_offs[l]
            new_h = []
            for j in range(fout):
                # W stored row-major as (fin, fout): W[i, j] at w0 + i*fout + j
                acc = h[0] * p_ref[w0 + j]
                for i in range(1, fin):
                    acc = acc + h[i] * p_ref[w0 + i * fout + j]
                acc = acc + p_ref[b0 + j]
                if l < n_layers - 1:
                    # sigmoid(x) == 0.5*tanh(0.5*x)+0.5 : tanh lowers to the EUP
                    # (idle slot) instead of a VALU divide.  Dropout(eval) == id.
                    acc = 0.5 * jnp.tanh(0.5 * acc) + 0.5
                new_h.append(acc)
            h = new_h
        out_ref[...] = h[0].astype(out_ref.dtype)  # final layer has fout == 1

    return kernel


def _pack_params(params):
    """Flatten [(W(in,out), b(1,out)), ...] into one f32 blob for SMEM."""
    flat = []
    for w, b in params:
        flat.append(w.reshape(-1))
        flat.append(b.reshape(-1))
    return jnp.concatenate(flat).astype(jnp.float32)


def ouffn_forward(x, params, *, tile_b=128 * 1024):
    """x: (B, hidden_units[0]). Returns (B,) after squeeze (matches PyTorch eval).

    tile_b: batch elements per grid step; must be a multiple of 1024 so the
    (TB//128, 128) slab satisfies the (8, 128) block constraint.
    """
    B, F = x.shape
    dims = [w.shape[0] for w, _ in params] + [params[-1][0].shape[1]]
    assert F == dims[0] and dims[-1] == 1

    p = _pack_params(params)

    # Adaptive tile: never pad a small batch up to a huge tile.
    tile_b = _round_up(int(tile_b), 1024)
    B_pad = _round_up(B, 1024)
    TB = min(tile_b, B_pad)
    B_pad = _round_up(B_pad, TB)
    S = TB // 128                 # sublane-slab count per tile (multiple of 8)
    grid = (B_pad // TB,)

    if B_pad != B:
        x = jnp.pad(x, ((0, B_pad - B), (0, 0)))
    # (F, B_pad//128, 128): batch dense on both sublane and lane axes.
    # TODO(synk): this transpose is an extra HBM pass; fuse by jitting the caller
    # or by accepting feature-major input from the producer.
    x_slab = x.T.reshape(F, B_pad // 128, 128)

    # VMEM budget: double-buffered in (F*TB*4) + out (TB*4) + live temporaries.
    step_bytes = TB * 4 * (F + 1) * 2 + TB * 4 * 8
    vmem_limit = int(min(48 << 20, max(32 << 20, step_bytes * 2)))

    # Advisory cost estimate for XLA scheduling around this call.
    flops_row = sum(2 * fi * fo + fo for fi, fo in zip(dims[:-1], dims[1:]))
    trans_row = sum(dims[1:-1])
    cost = pl.CostEstimate(
        flops=int(flops_row * B_pad),
        transcendentals=int(trans_row * B_pad),
        bytes_accessed=int(B_pad * (F + 1) * 4 + p.size * 4),
    )

    kernel = _make_ouffn_kernel(dims)

    out = pl.pallas_call(
        kernel,
        out_shape=jax.ShapeDtypeStruct((B_pad // 128, 128), jnp.float32),
        grid=grid,
        in_specs=[
            pl.BlockSpec(memory_space=pltpu.MemorySpace.SMEM),   # packed params
            pl.BlockSpec((F, S, 128), lambda i: (0, i, 0)),      # x slabs
        ],
        out_specs=pl.BlockSpec((S, 128), lambda i: (i, 0)),
        compiler_params=pltpu.CompilerParams(
            dimension_semantics=("parallel",),
            vmem_limit_bytes=vmem_limit,
        ),
        cost_estimate=cost,
    )(p, x_slab)

    # finalLayer(x).squeeze(): flatten slabs back to batch order, trim padding.
    # TODO(synk): for B == 1 PyTorch .squeeze() yields a 0-d tensor; we return (1,).
    return out.reshape(-1)[:B]


def init_params(key, hidden_units=(4, 4, 4, 4)):
    """PyTorch-Linear-style init: U(-1/sqrt(fan_in), 1/sqrt(fan_in))."""
    params = []
    dims = list(hidden_units) + [1]
    for i in range(len(dims) - 1):
        fan_in, fan_out = dims[i], dims[i + 1]
        key, kw, kb = jax.random.split(key, 3)
        bound = 1.0 / jnp.sqrt(fan_in)
        w = jax.random.uniform(kw, (fan_in, fan_out), jnp.float32, -bound, bound)
        b = jax.random.uniform(kb, (1, fan_out), jnp.float32, -bound, bound)
        params.append((w, b))
    return params


def reference_forward(x, params):
    h = x
    for i, (w, b) in enumerate(params):
        h = h @ w + b
        if i < len(params) - 1:
            h = jax.nn.sigmoid(h)
    return h[:, 0]


if __name__ == "__main__":
    key = jax.random.PRNGKey(0)
    kx, kp = jax.random.split(key)

    hidden_units = (4, 4, 4, 4)
    B = 2500  # not a multiple of 128/1024 -> exercises padding + trimming
    x = jax.random.normal(kx, (B, hidden_units[0]), dtype=jnp.float32)
    params = init_params(kp, hidden_units)

    # Small tile -> multi-step grid so the pipelining / padding paths run;
    # jit so pad + transpose + reshape fuse into the graph feeding pallas_call.
    fwd = jax.jit(functools.partial(ouffn_forward, tile_b=1024))
    y = jax.block_until_ready(fwd(x, params))

    y_ref = reference_forward(x, params)
    assert y.shape == (B,)
    assert jnp.allclose(y, y_ref, atol=1e-5, rtol=1e-5), "mismatch vs reference"

    print("KERNEL_OK")
</pallas_src>

<mosaic_0001>
module attributes {stable_mosaic.version = 11 : i64} {
  func.func @kernel(%arg0: i32, %arg1: memref<65xf32, #tpu.memory_space<smem>>, %arg2: memref<4x8x128xf32, #tpu.memory_space<vmem>>, %arg3: memref<8x128xf32, #tpu.memory_space<vmem>>) attributes {dimension_semantics = [#tpu.dimension_semantics<parallel>], iteration_bounds = array<i64: 3>, scalar_prefetch = 0 : i64, scratch_operands = 0 : i64, tpu.core_type = #tpu.core_type<tc>, window_params = [{transform_indices = @transform_0, window_bounds = array<i64: 65>}, {transform_indices = @transform_1, window_bounds = array<i64: 4, 8, 128>}, {transform_indices = @transform_2, window_bounds = array<i64: 8, 128>}]} {
    %c0 = arith.constant 0 : index
    %c0_0 = arith.constant 0 : index
    %c0_1 = arith.constant 0 : index
    %0 = vector.load %arg2[%c0, %c0_0, %c0_1] : memref<4x8x128xf32, #tpu.memory_space<vmem>>, vector<1x8x128xf32>
    %1 = vector.shape_cast %0 : vector<1x8x128xf32> to vector<8x128xf32>
    %c1 = arith.constant 1 : index
    %c0_2 = arith.constant 0 : index
    %c0_3 = arith.constant 0 : index
    %2 = vector.load %arg2[%c1, %c0_2, %c0_3] : memref<4x8x128xf32, #tpu.memory_space<vmem>>, vector<1x8x128xf32>
    %3 = vector.shape_cast %2 : vector<1x8x128xf32> to vector<8x128xf32>
    %c2 = arith.constant 2 : index
    %c0_4 = arith.constant 0 : index
    %c0_5 = arith.constant 0 : index
    %4 = vector.load %arg2[%c2, %c0_4, %c0_5] : memref<4x8x128xf32, #tpu.memory_space<vmem>>, vector<1x8x128xf32>
    %5 = vector.shape_cast %4 : vector<1x8x128xf32> to vector<8x128xf32>
    %c3 = arith.constant 3 : index
    %c0_6 = arith.constant 0 : index
    %c0_7 = arith.constant 0 : index
    %6 = vector.load %arg2[%c3, %c0_6, %c0_7] : memref<4x8x128xf32, #tpu.memory_space<vmem>>, vector<1x8x128xf32>
    %7 = vector.shape_cast %6 : vector<1x8x128xf32> to vector<8x128xf32>
    %c0_8 = arith.constant 0 : index
    %8 = memref.load %arg1[%c0_8] : memref<65xf32, #tpu.memory_space<smem>>
    %9 = vector.broadcast %8 : f32 to vector<8x128xf32>
    %10 = arith.mulf %1, %9 : vector<8x128xf32>
    %c4 = arith.constant 4 : index
    %11 = memref.load %arg1[%c4] : memref<65xf32, #tpu.memory_space<smem>>
    %12 = vector.broadcast %11 : f32 to vector<8x128xf32>
    %13 = arith.mulf %3, %12 : vector<8x128xf32>
    %14 = arith.addf %10, %13 : vector<8x128xf32>
    %c8 = arith.constant 8 : index
    %15 = memref.load %arg1[%c8] : memref<65xf32, #tpu.memory_space<smem>>
    %16 = vector.broadcast %15 : f32 to vector<8x128xf32>
    %17 = arith.mulf %5, %16 : vector<8x128xf32>
    %18 = arith.addf %14, %17 : vector<8x128xf32>
    %c12 = arith.constant 12 : index
    %19 = memref.load %arg1[%c12] : memref<65xf32, #tpu.memory_space<smem>>
    %20 = vector.broadcast %19 : f32 to vector<8x128xf32>
    %21 = arith.mulf %7, %20 : vector<8x128xf32>
    %22 = arith.addf %18, %21 : vector<8x128xf32>
    %c16 = arith.constant 16 : index
    %23 = memref.load %arg1[%c16] : memref<65xf32, #tpu.memory_space<smem>>
    %24 = vector.broadcast %23 : f32 to vector<8x128xf32>
    %25 = arith.addf %22, %24 : vector<8x128xf32>
    %cst = arith.constant 5.000000e-01 : f32
    %26 = vector.broadcast %cst : f32 to vector<8x128xf32>
    %27 = arith.mulf %26, %25 : vector<8x128xf32>
    %28 = math.tanh %27 : vector<8x128xf32>
    %cst_9 = arith.constant 5.000000e-01 : f32
    %29 = vector.broadcast %cst_9 : f32 to vector<8x128xf32>
    %30 = arith.mulf %29, %28 : vector<8x128xf32>
    %cst_10 = arith.constant 5.000000e-01 : f32
    %31 = vector.broadcast %cst_10 : f32 to vector<8x128xf32>
    %32 = arith.addf %30, %31 : vector<8x128xf32>
    %c1_11 = arith.constant 1 : index
    %33 = memref.load %arg1[%c1_11] : memref<65xf32, #tpu.memory_space<smem>>
    %34 = vector.broadcast %33 : f32 to vector<8x128xf32>
    %35 = arith.mulf %1, %34 : vector<8x128xf32>
    %c5 = arith.constant 5 : index
    %36 = memref.load %arg1[%c5] : memref<65xf32, #tpu.memory_space<smem>>
    %37 = vector.broadcast %36 : f32 to vector<8x128xf32>
    %38 = arith.mulf %3, %37 : vector<8x128xf32>
    %39 = arith.addf %35, %38 : vector<8x128xf32>
    %c9 = arith.constant 9 : index
    %40 = memref.load %arg1[%c9] : memref<65xf32, #tpu.memory_space<smem>>
    %41 = vector.broadcast %40 : f32 to vector<8x128xf32>
    %42 = arith.mulf %5, %41 : vector<8x128xf32>
    %43 = arith.addf %39, %42 : vector<8x128xf32>
    %c13 = arith.constant 13 : index
    %44 = memref.load %arg1[%c13] : memref<65xf32, #tpu.memory_space<smem>>
    %45 = vector.broadcast %44 : f32 to vector<8x128xf32>
    %46 = arith.mulf %7, %45 : vector<8x128xf32>
    %47 = arith.addf %43, %46 : vector<8x128xf32>
    %c17 = arith.constant 17 : index
    %48 = memref.load %arg1[%c17] : memref<65xf32, #tpu.memory_space<smem>>
    %49 = vector.broadcast %48 : f32 to vector<8x128xf32>
    %50 = arith.addf %47, %49 : vector<8x128xf32>
    %cst_12 = arith.constant 5.000000e-01 : f32
    %51 = vector.broadcast %cst_12 : f32 to vector<8x128xf32>
    %52 = arith.mulf %51, %50 : vector<8x128xf32>
    %53 = math.tanh %52 : vector<8x128xf32>
    %cst_13 = arith.constant 5.000000e-01 : f32
    %54 = vector.broadcast %cst_13 : f32 to vector<8x128xf32>
    %55 = arith.mulf %54, %53 : vector<8x128xf32>
    %cst_14 = arith.constant 5.000000e-01 : f32
    %56 = vector.broadcast %cst_14 : f32 to vector<8x128xf32>
    %57 = arith.addf %55, %56 : vector<8x128xf32>
    %c2_15 = arith.constant 2 : index
    %58 = memref.load %arg1[%c2_15] : memref<65xf32, #tpu.memory_space<smem>>
    %59 = vector.broadcast %58 : f32 to vector<8x128xf32>
    %60 = arith.mulf %1, %59 : vector<8x128xf32>
    %c6 = arith.constant 6 : index
    %61 = memref.load %arg1[%c6] : memref<65xf32, #tpu.memory_space<smem>>
    %62 = vector.broadcast %61 : f32 to vector<8x128xf32>
    %63 = arith.mulf %3, %62 : vector<8x128xf32>
    %64 = arith.addf %60, %63 : vector<8x128xf32>
    %c10 = arith.constant 10 : index
    %65 = memref.load %arg1[%c10] : memref<65xf32, #tpu.memory_space<smem>>
    %66 = vector.broadcast %65 : f32 to vector<8x128xf32>
    %67 = arith.mulf %5, %66 : vector<8x128xf32>
    %68 = arith.addf %64, %67 : vector<8x128xf32>
    %c14 = arith.constant 14 : index
    %69 = memref.load %arg1[%c14] : memref<65xf32, #tpu.memory_space<smem>>
    %70 = vector.broadcast %69 : f32 to vector<8x128xf32>
    %71 = arith.mulf %7, %70 : vector<8x128xf32>
    %72 = arith.addf %68, %71 : vector<8x128xf32>
    %c18 = arith.constant 18 : index
    %73 = memref.load %arg1[%c18] : memref<65xf32, #tpu.memory_space<smem>>
    %74 = vector.broadcast %73 : f32 to vector<8x128xf32>
    %75 = arith.addf %72, %74 : vector<8x128xf32>
    %cst_16 = arith.constant 5.000000e-01 : f32
    %76 = vector.broadcast %cst_16 : f32 to vector<8x128xf32>
    %77 = arith.mulf %76, %75 : vector<8x128xf32>
    %78 = math.tanh %77 : vector<8x128xf32>
    %cst_17 = arith.constant 5.000000e-01 : f32
    %79 = vector.broadcast %cst_17 : f32 to vector<8x128xf32>
    %80 = arith.mulf %79, %78 : vector<8x128xf32>
    %cst_18 = arith.constant 5.000000e-01 : f32
    %81 = vector.broadcast %cst_18 : f32 to vector<8x128xf32>
    %82 = arith.addf %80, %81 : vector<8x128xf32>
    %c3_19 = arith.constant 3 : index
    %83 = memref.load %arg1[%c3_19] : memref<65xf32, #tpu.memory_space<smem>>
    %84 = vector.broadcast %83 : f32 to vector<8x128xf32>
    %85 = arith.mulf %1, %84 : vector<8x128xf32>
    %c7 = arith.constant 7 : index
    %86 = memref.load %arg1[%c7] : memref<65xf32, #tpu.memory_space<smem>>
    %87 = vector.broadcast %86 : f32 to vector<8x128xf32>
    %88 = arith.mulf %3, %87 : vector<8x128xf32>
    %89 = arith.addf %85, %88 : vector<8x128xf32>
    %c11 = arith.constant 11 : index
    %90 = memref.load %arg1[%c11] : memref<65xf32, #tpu.memory_space<smem>>
    %91 = vector.broadcast %90 : f32 to vector<8x128xf32>
    %92 = arith.mulf %5, %91 : vector<8x128xf32>
    %93 = arith.addf %89, %92 : vector<8x128xf32>
    %c15 = arith.constant 15 : index
    %94 = memref.load %arg1[%c15] : memref<65xf32, #tpu.memory_space<smem>>
    %95 = vector.broadcast %94 : f32 to vector<8x128xf32>
    %96 = arith.mulf %7, %95 : vector<8x128xf32>
    %97 = arith.addf %93, %96 : vector<8x128xf32>
    %c19 = arith.constant 19 : index
    %98 = memref.load %arg1[%c19] : memref<65xf32, #tpu.memory_space<smem>>
    %99 = vector.broadcast %98 : f32 to vector<8x128xf32>
    %100 = arith.addf %97, %99 : vector<8x128xf32>
    %cst_20 = arith.constant 5.000000e-01 : f32
    %101 = vector.broadcast %cst_20 : f32 to vector<8x128xf32>
    %102 = arith.mulf %101, %100 : vector<8x128xf32>
    %103 = math.tanh %102 : vector<8x128xf32>
    %cst_21 = arith.constant 5.000000e-01 : f32
    %104 = vector.broadcast %cst_21 : f32 to vector<8x128xf32>
    %105 = arith.mulf %104, %103 : vector<8x128xf32>
    %cst_22 = arith.constant 5.000000e-01 : f32
    %106 = vector.broadcast %cst_22 : f32 to vector<8x128xf32>
    %107 = arith.addf %105, %106 : vector<8x128xf32>
    %c20 = arith.constant 20 : index
    %108 = memref.load %arg1[%c20] : memref<65xf32, #tpu.memory_space<smem>>
    %109 = vector.broadcast %108 : f32 to vector<8x128xf32>
    %110 = arith.mulf %32, %109 : vector<8x128xf32>
    %c24 = arith.constant 24 : index
    %111 = memref.load %arg1[%c24] : memref<65xf32, #tpu.memory_space<smem>>
    %112 = vector.broadcast %111 : f32 to vector<8x128xf32>
    %113 = arith.mulf %57, %112 : vector<8x128xf32>
    %114 = arith.addf %110, %113 : vector<8x128xf32>
    %c28 = arith.constant 28 : index
    %115 = memref.load %arg1[%c28] : memref<65xf32, #tpu.memory_space<smem>>
    %116 = vector.broadcast %115 : f32 to vector<8x128xf32>
    %117 = arith.mulf %82, %116 : vector<8x128xf32>
    %118 = arith.addf %114, %117 : vector<8x128xf32>
    %c32 = arith.constant 32 : index
    %119 = memref.load %arg1[%c32] : memref<65xf32, #tpu.memory_space<smem>>
    %120 = vector.broadcast %119 : f32 to vector<8x128xf32>
    %121 = arith.mulf %107, %120 : vector<8x128xf32>
    %122 = arith.addf %118, %121 : vector<8x128xf32>
    %c36 = arith.constant 36 : index
    %123 = memref.load %arg1[%c36] : memref<65xf32, #tpu.memory_space<smem>>
    %124 = vector.broadcast %123 : f32 to vector<8x128xf32>
    %125 = arith.addf %122, %124 : vector<8x128xf32>
    %cst_23 = arith.constant 5.000000e-01 : f32
    %126 = vector.broadcast %cst_23 : f32 to vector<8x128xf32>
    %127 = arith.mulf %126, %125 : vector<8x128xf32>
    %128 = math.tanh %127 : vector<8x128xf32>
    %cst_24 = arith.constant 5.000000e-01 : f32
    %129 = vector.broadcast %cst_24 : f32 to vector<8x128xf32>
    %130 = arith.mulf %129, %128 : vector<8x128xf32>
    %cst_25 = arith.constant 5.000000e-01 : f32
    %131 = vector.broadcast %cst_25 : f32 to vector<8x128xf32>
    %132 = arith.addf %130, %131 : vector<8x128xf32>
    %c21 = arith.constant 21 : index
    %133 = memref.load %arg1[%c21] : memref<65xf32, #tpu.memory_space<smem>>
    %134 = vector.broadcast %133 : f32 to vector<8x128xf32>
    %135 = arith.mulf %32, %134 : vector<8x128xf32>
    %c25 = arith.constant 25 : index
    %136 = memref.load %arg1[%c25] : memref<65xf32, #tpu.memory_space<smem>>
    %137 = vector.broadcast %136 : f32 to vector<8x128xf32>
    %138 = arith.mulf %57, %137 : vector<8x128xf32>
    %139 = arith.addf %135, %138 : vector<8x128xf32>
    %c29 = arith.constant 29 : index
    %140 = memref.load %arg1[%c29] : memref<65xf32, #tpu.memory_space<smem>>
    %141 = vector.broadcast %140 : f32 to vector<8x128xf32>
    %142 = arith.mulf %82, %141 : vector<8x128xf32>
    %143 = arith.addf %139, %142 : vector<8x128xf32>
    %c33 = arith.constant 33 : index
    %144 = memref.load %arg1[%c33] : memref<65xf32, #tpu.memory_space<smem>>
    %145 = vector.broadcast %144 : f32 to vector<8x128xf32>
    %146 = arith.mulf %107, %145 : vector<8x128xf32>
    %147 = arith.addf %143, %146 : vector<8x128xf32>
    %c37 = arith.constant 37 : index
    %148 = memref.load %arg1[%c37] : memref<65xf32, #tpu.memory_space<smem>>
    %149 = vector.broadcast %148 : f32 to vector<8x128xf32>
    %150 = arith.addf %147, %149 : vector<8x128xf32>
    %cst_26 = arith.constant 5.000000e-01 : f32
    %151 = vector.broadcast %cst_26 : f32 to vector<8x128xf32>
    %152 = arith.mulf %151, %150 : vector<8x128xf32>
    %153 = math.tanh %152 : vector<8x128xf32>
    %cst_27 = arith.constant 5.000000e-01 : f32
    %154 = vector.broadcast %cst_27 : f32 to vector<8x128xf32>
    %155 = arith.mulf %154, %153 : vector<8x128xf32>
    %cst_28 = arith.constant 5.000000e-01 : f32
    %156 = vector.broadcast %cst_28 : f32 to vector<8x128xf32>
    %157 = arith.addf %155, %156 : vector<8x128xf32>
    %c22 = arith.constant 22 : index
    %158 = memref.load %arg1[%c22] : memref<65xf32, #tpu.memory_space<smem>>
    %159 = vector.broadcast %158 : f32 to vector<8x128xf32>
    %160 = arith.mulf %32, %159 : vector<8x128xf32>
    %c26 = arith.constant 26 : index
    %161 = memref.load %arg1[%c26] : memref<65xf32, #tpu.memory_space<smem>>
    %162 = vector.broadcast %161 : f32 to vector<8x128xf32>
    %163 = arith.mulf %57, %162 : vector<8x128xf32>
    %164 = arith.addf %160, %163 : vector<8x128xf32>
    %c30 = arith.constant 30 : index
    %165 = memref.load %arg1[%c30] : memref<65xf32, #tpu.memory_space<smem>>
    %166 = vector.broadcast %165 : f32 to vector<8x128xf32>
    %167 = arith.mulf %82, %166 : vector<8x128xf32>
    %168 = arith.addf %164, %167 : vector<8x128xf32>
    %c34 = arith.constant 34 : index
    %169 = memref.load %arg1[%c34] : memref<65xf32, #tpu.memory_space<smem>>
    %170 = vector.broadcast %169 : f32 to vector<8x128xf32>
    %171 = arith.mulf %107, %170 : vector<8x128xf32>
    %172 = arith.addf %168, %171 : vector<8x128xf32>
    %c38 = arith.constant 38 : index
    %173 = memref.load %arg1[%c38] : memref<65xf32, #tpu.memory_space<smem>>
    %174 = vector.broadcast %173 : f32 to vector<8x128xf32>
    %175 = arith.addf %172, %174 : vector<8x128xf32>
    %cst_29 = arith.constant 5.000000e-01 : f32
    %176 = vector.broadcast %cst_29 : f32 to vector<8x128xf32>
    %177 = arith.mulf %176, %175 : vector<8x128xf32>
    %178 = math.tanh %177 : vector<8x128xf32>
    %cst_30 = arith.constant 5.000000e-01 : f32
    %179 = vector.broadcast %cst_30 : f32 to vector<8x128xf32>
    %180 = arith.mulf %179, %178 : vector<8x128xf32>
    %cst_31 = arith.constant 5.000000e-01 : f32
    %181 = vector.broadcast %cst_31 : f32 to vector<8x128xf32>
    %182 = arith.addf %180, %181 : vector<8x128xf32>
    %c23 = arith.constant 23 : index
    %183 = memref.load %arg1[%c23] : memref<65xf32, #tpu.memory_space<smem>>
    %184 = vector.broadcast %183 : f32 to vector<8x128xf32>
    %185 = arith.mulf %32, %184 : vector<8x128xf32>
    %c27 = arith.constant 27 : index
    %186 = memref.load %arg1[%c27] : memref<65xf32, #tpu.memory_space<smem>>
    %187 = vector.broadcast %186 : f32 to vector<8x128xf32>
    %188 = arith.mulf %57, %187 : vector<8x128xf32>
    %189 = arith.addf %185, %188 : vector<8x128xf32>
    %c31 = arith.constant 31 : index
    %190 = memref.load %arg1[%c31] : memref<65xf32, #tpu.memory_space<smem>>
    %191 = vector.broadcast %190 : f32 to vector<8x128xf32>
    %192 = arith.mulf %82, %191 : vector<8x128xf32>
    %193 = arith.addf %189, %192 : vector<8x128xf32>
    %c35 = arith.constant 35 : index
    %194 = memref.load %arg1[%c35] : memref<65xf32, #tpu.memory_space<smem>>
    %195 = vector.broadcast %194 : f32 to vector<8x128xf32>
    %196 = arith.mulf %107, %195 : vector<8x128xf32>
    %197 = arith.addf %193, %196 : vector<8x128xf32>
    %c39 = arith.constant 39 : index
    %198 = memref.load %arg1[%c39] : memref<65xf32, #tpu.memory_space<smem>>
    %199 = vector.broadcast %198 : f32 to vector<8x128xf32>
    %200 = arith.addf %197, %199 : vector<8x128xf32>
    %cst_32 = arith.constant 5.000000e-01 : f32
    %201 = vector.broadcast %cst_32 : f32 to vector<8x128xf32>
    %202 = arith.mulf %201, %200 : vector<8x128xf32>
    %203 = math.tanh %202 : vector<8x128xf32>
    %cst_33 = arith.constant 5.000000e-01 : f32
    %204 = vector.broadcast %cst_33 : f32 to vector<8x128xf32>
    %205 = arith.mulf %204, %203 : vector<8x128xf32>
    %cst_34 = arith.constant 5.000000e-01 : f32
    %206 = vector.broadcast %cst_34 : f32 to vector<8x128xf32>
    %207 = arith.addf %205, %206 : vector<8x128xf32>
    %c40 = arith.constant 40 : index
    %208 = memref.load %arg1[%c40] : memref<65xf32, #tpu.memory_space<smem>>
    %209 = vector.broadcast %208 : f32 to vector<8x128xf32>
    %210 = arith.mulf %132, %209 : vector<8x128xf32>
    %c44 = arith.constant 44 : index
    %211 = memref.load %arg1[%c44] : memref<65xf32, #tpu.memory_space<smem>>
    %212 = vector.broadcast %211 : f32 to vector<8x128xf32>
    %213 = arith.mulf %157, %212 : vector<8x128xf32>
    %214 = arith.addf %210, %213 : vector<8x128xf32>
    %c48 = arith.constant 48 : index
    %215 = memref.load %arg1[%c48] : memref<65xf32, #tpu.memory_space<smem>>
    %216 = vector.broadcast %215 : f32 to vector<8x128xf32>
    %217 = arith.mulf %182, %216 : vector<8x128xf32>
    %218 = arith.addf %214, %217 : vector<8x128xf32>
    %c52 = arith.constant 52 : index
    %219 = memref.load %arg1[%c52] : memref<65xf32, #tpu.memory_space<smem>>
    %220 = vector.broadcast %219 : f32 to vector<8x128xf32>
    %221 = arith.mulf %207, %220 : vector<8x128xf32>
    %222 = arith.addf %218, %221 : vector<8x128xf32>
    %c56 = arith.constant 56 : index
    %223 = memref.load %arg1[%c56] : memref<65xf32, #tpu.memory_space<smem>>
    %224 = vector.broadcast %223 : f32 to vector<8x128xf32>
    %225 = arith.addf %222, %224 : vector<8x128xf32>
    %cst_35 = arith.constant 5.000000e-01 : f32
    %226 = vector.broadcast %cst_35 : f32 to vector<8x128xf32>
    %227 = arith.mulf %226, %225 : vector<8x128xf32>
    %228 = math.tanh %227 : vector<8x128xf32>
    %cst_36 = arith.constant 5.000000e-01 : f32
    %229 = vector.broadcast %cst_36 : f32 to vector<8x128xf32>
    %230 = arith.mulf %229, %228 : vector<8x128xf32>
    %cst_37 = arith.constant 5.000000e-01 : f32
    %231 = vector.broadcast %cst_37 : f32 to vector<8x128xf32>
    %232 = arith.addf %230, %231 : vector<8x128xf32>
    %c41 = arith.constant 41 : index
    %233 = memref.load %arg1[%c41] : memref<65xf32, #tpu.memory_space<smem>>
    %234 = vector.broadcast %233 : f32 to vector<8x128xf32>
    %235 = arith.mulf %132, %234 : vector<8x128xf32>
    %c45 = arith.constant 45 : index
    %236 = memref.load %arg1[%c45] : memref<65xf32, #tpu.memory_space<smem>>
    %237 = vector.broadcast %236 : f32 to vector<8x128xf32>
    %238 = arith.mulf %157, %237 : vector<8x128xf32>
    %239 = arith.addf %235, %238 : vector<8x128xf32>
    %c49 = arith.constant 49 : index
    %240 = memref.load %arg1[%c49] : memref<65xf32, #tpu.memory_space<smem>>
    %241 = vector.broadcast %240 : f32 to vector<8x128xf32>
    %242 = arith.mulf %182, %241 : vector<8x128xf32>
    %243 = arith.addf %239, %242 : vector<8x128xf32>
    %c53 = arith.constant 53 : index
    %244 = memref.load %arg1[%c53] : memref<65xf32, #tpu.memory_space<smem>>
    %245 = vector.broadcast %244 : f32 to vector<8x128xf32>
    %246 = arith.mulf %207, %245 : vector<8x128xf32>
    %247 = arith.addf %243, %246 : vector<8x128xf32>
    %c57 = arith.constant 57 : index
    %248 = memref.load %arg1[%c57] : memref<65xf32, #tpu.memory_space<smem>>
    %249 = vector.broadcast %248 : f32 to vector<8x128xf32>
    %250 = arith.addf %247, %249 : vector<8x128xf32>
    %cst_38 = arith.constant 5.000000e-01 : f32
    %251 = vector.broadcast %cst_38 : f32 to vector<8x128xf32>
    %252 = arith.mulf %251, %250 : vector<8x128xf32>
    %253 = math.tanh %252 : vector<8x128xf32>
    %cst_39 = arith.constant 5.000000e-01 : f32
    %254 = vector.broadcast %cst_39 : f32 to vector<8x128xf32>
    %255 = arith.mulf %254, %253 : vector<8x128xf32>
    %cst_40 = arith.constant 5.000000e-01 : f32
    %256 = vector.broadcast %cst_40 : f32 to vector<8x128xf32>
    %257 = arith.addf %255, %256 : vector<8x128xf32>
    %c42 = arith.constant 42 : index
    %258 = memref.load %arg1[%c42] : memref<65xf32, #tpu.memory_space<smem>>
    %259 = vector.broadcast %258 : f32 to vector<8x128xf32>
    %260 = arith.mulf %132, %259 : vector<8x128xf32>
    %c46 = arith.constant 46 : index
    %261 = memref.load %arg1[%c46] : memref<65xf32, #tpu.memory_space<smem>>
    %262 = vector.broadcast %261 : f32 to vector<8x128xf32>
    %263 = arith.mulf %157, %262 : vector<8x128xf32>
    %264 = arith.addf %260, %263 : vector<8x128xf32>
    %c50 = arith.constant 50 : index
    %265 = memref.load %arg1[%c50] : memref<65xf32, #tpu.memory_space<smem>>
    %266 = vector.broadcast %265 : f32 to vector<8x128xf32>
    %267 = arith.mulf %182, %266 : vector<8x128xf32>
    %268 = arith.addf %264, %267 : vector<8x128xf32>
    %c54 = arith.constant 54 : index
    %269 = memref.load %arg1[%c54] : memref<65xf32, #tpu.memory_space<smem>>
    %270 = vector.broadcast %269 : f32 to vector<8x128xf32>
    %271 = arith.mulf %207, %270 : vector<8x128xf32>
    %272 = arith.addf %268, %271 : vector<8x128xf32>
    %c58 = arith.constant 58 : index
    %273 = memref.load %arg1[%c58] : memref<65xf32, #tpu.memory_space<smem>>
    %274 = vector.broadcast %273 : f32 to vector<8x128xf32>
    %275 = arith.addf %272, %274 : vector<8x128xf32>
    %cst_41 = arith.constant 5.000000e-01 : f32
    %276 = vector.broadcast %cst_41 : f32 to vector<8x128xf32>
    %277 = arith.mulf %276, %275 : vector<8x128xf32>
    %278 = math.tanh %277 : vector<8x128xf32>
    %cst_42 = arith.constant 5.000000e-01 : f32
    %279 = vector.broadcast %cst_42 : f32 to vector<8x128xf32>
    %280 = arith.mulf %279, %278 : vector<8x128xf32>
    %cst_43 = arith.constant 5.000000e-01 : f32
    %281 = vector.broadcast %cst_43 : f32 to vector<8x128xf32>
    %282 = arith.addf %280, %281 : vector<8x128xf32>
    %c43 = arith.constant 43 : index
    %283 = memref.load %arg1[%c43] : memref<65xf32, #tpu.memory_space<smem>>
    %284 = vector.broadcast %283 : f32 to vector<8x128xf32>
    %285 = arith.mulf %132, %284 : vector<8x128xf32>
    %c47 = arith.constant 47 : index
    %286 = memref.load %arg1[%c47] : memref<65xf32, #tpu.memory_space<smem>>
    %287 = vector.broadcast %286 : f32 to vector<8x128xf32>
    %288 = arith.mulf %157, %287 : vector<8x128xf32>
    %289 = arith.addf %285, %288 : vector<8x128xf32>
    %c51 = arith.constant 51 : index
    %290 = memref.load %arg1[%c51] : memref<65xf32, #tpu.memory_space<smem>>
    %291 = vector.broadcast %290 : f32 to vector<8x128xf32>
    %292 = arith.mulf %182, %291 : vector<8x128xf32>
    %293 = arith.addf %289, %292 : vector<8x128xf32>
    %c55 = arith.constant 55 : index
    %294 = memref.load %arg1[%c55] : memref<65xf32, #tpu.memory_space<smem>>
    %295 = vector.broadcast %294 : f32 to vector<8x128xf32>
    %296 = arith.mulf %207, %295 : vector<8x128xf32>
    %297 = arith.addf %293, %296 : vector<8x128xf32>
    %c59 = arith.constant 59 : index
    %298 = memref.load %arg1[%c59] : memref<65xf32, #tpu.memory_space<smem>>
    %299 = vector.broadcast %298 : f32 to vector<8x128xf32>
    %300 = arith.addf %297, %299 : vector<8x128xf32>
    %cst_44 = arith.constant 5.000000e-01 : f32
    %301 = vector.broadcast %cst_44 : f32 to vector<8x128xf32>
    %302 = arith.mulf %301, %300 : vector<8x128xf32>
    %303 = math.tanh %302 : vector<8x128xf32>
    %cst_45 = arith.constant 5.000000e-01 : f32
    %304 = vector.broadcast %cst_45 : f32 to vector<8x128xf32>
    %305 = arith.mulf %304, %303 : vector<8x128xf32>
    %cst_46 = arith.constant 5.000000e-01 : f32
    %306 = vector.broadcast %cst_46 : f32 to vector<8x128xf32>
    %307 = arith.addf %305, %306 : vector<8x128xf32>
    %c60 = arith.constant 60 : index
    %308 = memref.load %arg1[%c60] : memref<65xf32, #tpu.memory_space<smem>>
    %309 = vector.broadcast %308 : f32 to vector<8x128xf32>
    %310 = arith.mulf %232, %309 : vector<8x128xf32>
    %c61 = arith.constant 61 : index
    %311 = memref.load %arg1[%c61] : memref<65xf32, #tpu.memory_space<smem>>
    %312 = vector.broadcast %311 : f32 to vector<8x128xf32>
    %313 = arith.mulf %257, %312 : vector<8x128xf32>
    %314 = arith.addf %310, %313 : vector<8x128xf32>
    %c62 = arith.constant 62 : index
    %315 = memref.load %arg1[%c62] : memref<65xf32, #tpu.memory_space<smem>>
    %316 = vector.broadcast %315 : f32 to vector<8x128xf32>
    %317 = arith.mulf %282, %316 : vector<8x128xf32>
    %318 = arith.addf %314, %317 : vector<8x128xf32>
    %c63 = arith.constant 63 : index
    %319 = memref.load %arg1[%c63] : memref<65xf32, #tpu.memory_space<smem>>
    %320 = vector.broadcast %319 : f32 to vector<8x128xf32>
    %321 = arith.mulf %307, %320 : vector<8x128xf32>
    %322 = arith.addf %318, %321 : vector<8x128xf32>
    %c64 = arith.constant 64 : index
    %323 = memref.load %arg1[%c64] : memref<65xf32, #tpu.memory_space<smem>>
    %324 = vector.broadcast %323 : f32 to vector<8x128xf32>
    %325 = arith.addf %322, %324 : vector<8x128xf32>
    %c0_47 = arith.constant 0 : index
    %c0_48 = arith.constant 0 : index
    %326 = vector.load %arg3[%c0_47, %c0_48] : memref<8x128xf32, #tpu.memory_space<vmem>>, vector<8x128xf32>
    tpu.vector_store %arg3[%c0_47, %c0_48], %325 {strides = array<i32>} : memref<8x128xf32, #tpu.memory_space<vmem>>, vector<8x128xf32>,
    return
  }
  func.func @transform_0(%arg0: i32) -> i32 {
    %c0_i32 = arith.constant 0 : i32
    %c0_i32_0 = arith.constant 0 : i32
    return %c0_i32 : i32
  }
  func.func @transform_1(%arg0: i32) -> (i32, i32, i32) {
    %c0_i32 = arith.constant 0 : i32
    %c0_i32_0 = arith.constant 0 : i32
    %c0_i32_1 = arith.constant 0 : i32
    return %c0_i32, %arg0, %c0_i32_0 : i32, i32, i32
  }
  func.func @transform_2(%arg0: i32) -> (i32, i32) {
    %c0_i32 = arith.constant 0 : i32
    %c0_i32_0 = arith.constant 0 : i32
    return %arg0, %c0_i32 : i32, i32
  }
}

</mosaic_0001>

<bundles_post_ra>
// kernel: ouffn_forward.1
= control target key start
LH: loop header
LB: loop body
LE: loop exit
PB: predicated region body
PF: predicated region fallthrough
CT: control target
= control target key end

     0   :  { %7 = vsyncpa [#allocation4], 0  ;;  %s1081_s0 = inlined_call_operand.vmem [shape: f32[65], index: 0, kind: input, shape index: {}]   ;;  %s1082_s1 = inlined_call_operand.vmem [shape: f32[4,24,128], index: 1, kind: input, shape index: {}]   ;;  %s1083_s2 = inlined_call_operand.hbm [shape: f32[24,128], index: 2, kind: output, shape index: {}]  }
   0x1   :  { %8 = vsyncpa [#allocation3], 0 }
   0x2   :  { %10 = vsyncpa [#allocation3 + $0x1], 0  ;;  %s837_s9 = smov 0   ;;  %s839_s10 = smov 0  }
   0x3   :  { %s841_s11 = smov 0   ;;  %s843_s12 = smov 0  }
   0x4 LB: > { %s858_s13 = sadd.s32 4294967295, %s818_s12   ;;  %s584_s14 = sadd.s32 4294967294, %s818_s12   ;;  %s818_s12 = sphi %s843_s12, %s1094_s12   ;;  %s814_s11 = sphi %s841_s11, %s1093_s11   ;;  %s810_s10 = sphi %s839_s10, %s1092_s10   ;;  %s806_s9 = sphi %s837_s9, %s1091_s9  }
   0x5   : > { %s862_s15 = sadd.s32 1, %s818_s12   ;;  %s44_s16 = sadd.s32 1, %s814_s11 }
   0x6   : > { %s41_s17 = ssub.s32 %s818_s12, %s862_s15  ;;  %p51_p0 = scmp.ne.s32.totalorder %s814_s11, %s810_s10 }
   0x7   : > { %p42_p1 = scmp.eq.s32.totalorder %s41_s17, 0  ;;  %p52_p2 = scmp.eq.s32.totalorder %s818_s12, 0 }
   0x8   : > { %p81_p3 = scmp.eq.s32.totalorder %s858_s13, 2  ;;  %p86_p4 = scmp.ne.s32.totalorder %s810_s10, %s806_s9 }
   0x9   : > { %s874_s18 = scalar_select %p42_p1, %s814_s11, %s44_s16  }
   0xa   : > { %p876_p5 = por %p52_p2, %p51_p0  ;;  %p880_p6 = por %p81_p3, %p51_p0 }
   0xb   : > { %p87_p7 = scmp.eq.s32.totalorder %s584_s14, 2  ;;  %p585_p8 = scmp.ge.s32.totalorder %s818_s12, 1 }
   0xc   : > { %s1086_s20 = scalar_select %p880_p6, 1, 0 }
   0xd   : > { %p94_p9 = scmp.lt.s32.totalorder %s818_s12, 4  ;;  %p886_p10 = por %p87_p7, %p86_p4 }
   0xe   : > { %p679_p11 = scmp.eq.s32.totalorder %s858_s13, 0  ;;  %s107_s25 = sshll.u32 %s1081_s0, 4  ;;  %s108_s25 = int_to_ptr.vmem [resolvable:$true] %s107_s25 }
   0xf   : > { %s1087_s21 = scalar_select %p886_p10, 1, 0 }
  0x10   : > { %p891_p12 = pnand %p585_p8, %p94_p9  ;;  %s739_s26 = scalar_lea.vmem %s108_s25, 16 }
  0x11   : > { %p740_p1 = scmp.ne.s32.totalorder %s108_s25, %s739_s26  ;;  %p747_p7 = scmp.lt.s32.totalorder %s108_s25, %s108_s25 }
  0x12   : > { %p671_p13 = pneg %p891_p12  ;;  %p748_p8 = scmp.lt.s32.totalorder %s739_s26, %s739_s26 }
  0x14   : > { %p672_p0 = pnand %p679_p11, %p671_p13  ;;  %p749_p9 = por %p748_p8, %p747_p7 }
  0x16   : > { %p741_p2 = pneg %p672_p0 }
  0x18   : > { %p742_p3 = pnand %p741_p2, %p740_p1 }
  0x1a   : > { %p743_p4 = pneg %p742_p3 }
  0x1c   : > { %p750_p10 = pnand %p749_p9, %p743_p4 }
  0x1e   : > { %753 = shalt.err (!%p750_p10)
}
  0x1f   : > { %s820_s27 = smov [#allocation2]   ;;  %p587_p6 = scmp.ge.s32.totalorder %s818_s12, 3 }
  0x20   : > { %674 = dma.vmem_to_smem (!%p672_p0), %s108_s25, 16, %s820_s27, [#allocation4]  }
  0x21   : > { %114 = sbr.rel (%p587_p6) target bundleno = 44 (0x2c), region = 20 }
  0x26   : > { %117 = sbr.rel (!%p876_p5) target bundleno = 44 (0x2c), region = 24  ;;  %s119_s28 = sand.u32 (%p876_p5), 1, %s814_s11  }
  0x27   : > { %s589_s29 = sshll.u32 (%p876_p5), %s818_s12, 3  ;;  %s588_s30 = sshll.u32 (%p876_p5), %s119_s28, 5 }
  0x28   : > { %s123_s5 = scalar_lea.vmem (%p876_p5), %s1082_s1, %s589_s29  ;;  %s121_s6 = scalar_lea.vmem (%p876_p5), [#allocation5], %s588_s30 }
  0x29   : > { %v158_v0 = vld [vmem:[%s123_s5] sm:$0xff] (%p876_p5)  ;;  %v160_v1 = vld [vmem:[%s123_s5 + $0x18] sm:$0xff] (%p876_p5)  ;;  %v162_v2 = vld [vmem:[%s123_s5 + $0x30] sm:$0xff] (%p876_p5) }
  0x2a   : > { %159 = vst [vmem:[%s121_s6] sm:$0xff] (%p876_p5), %v158_v0  ;;  %161 = vst [vmem:[%s121_s6 + $0x8] sm:$0xff] (%p876_p5), %v160_v1  ;;  %v164_v3 = vld [vmem:[%s123_s5 + $0x48] sm:$0xff] (%p876_p5) }
  0x2b   : > { %163 = vst [vmem:[%s121_s6 + $0x10] sm:$0xff] %v162_v2  ;;  %165 = vst [vmem:[%s121_s6 + $0x18] sm:$0xff] %v164_v3 }
  0x2c PF: > { %174 = sbr.rel (%p891_p12) target bundleno = 188 (0xbc), region = 62 }
  0x31   : > { %797 = dma.done.wait (%p679_p11), [#allocation4], 16  }
  0x32   : > { %799 = vsyncadd (%p679_p11), [#allocation4], 4294967280  ;;  %s917_s7 = sand.u32 1, %s810_s10  }
  0x33   : > { %s592_s8 = sshll.u32 %s917_s7, 5 }
  0x34   : > { %s183_s14 = scalar_lea.vmem [#allocation5], %s592_s8 }
  0x35   : > { %187 = sfence }
  0x36   : > { %s210_s16 = sld [smem:[#allocation2]]  ;;  %v203_v4 = vld [vmem:[%s183_s14] sm:$0xff]  ;;  %v594_v5 = vld [vmem:[%s183_s14 + $0x8] sm:$0xff]  ;;  %v595_v6 = vld [vmem:[%s183_s14 + $0x10] sm:$0xff]  ;;  %p1089_p6 = scmp.ne.s32.totalorder %s1086_s20, 0 }
  0x37   : > { %s597_s17 = sld [smem:[#allocation2 + $0x4]]  ;;  %v922_v8 = vld [vmem:[%s183_s14 + $0x18] sm:$0xff] }
  0x38   : > { %s598_s19 = sld [smem:[#allocation2 + $0x8]] }
  0x39   : > { %s599_s23 = sld [smem:[#allocation2 + $0xc]] }
  0x3a   : > { %s920_s22 = sld [smem:[#allocation2 + $0x10]] }
  0x3b   : > { %s601_s24 = sld [smem:[#allocation2 + $0x1]] }
  0x3c   : > { %v211_v7 = vstv %s210_s16  ;;  %s602_s25 = sld [smem:[#allocation2 + $0x5]] }
  0x3d   : > { %v212_v9 = vmul.f32 %v211_v7, %v203_v4  ;;  %v214_v10 = vstv %s597_s17  ;;  %s603_s26 = sld [smem:[#allocation2 + $0x9]] }
  0x3e   : > { %v215_v11 = vmul.f32 %v594_v5, %v214_v10  ;;  %v218_v12 = vstv %s598_s19  ;;  %s604_s27 = sld [smem:[#allocation2 + $0xd]] }
  0x3f   : > { %v219_v13 = vmul.f32 %v595_v6, %v218_v12  ;;  %v222_v14 = vstv %s599_s23  ;;  %s924_s28 = sld [smem:[#allocation2 + $0x11]] }
  0x40   : > { %v216_v15 = vadd.f32 %v215_v11, %v212_v9  ;;  %v223_v16 = vmul.f32 %v922_v8, %v222_v14  ;;  %s606_s29 = sld [smem:[#allocation2 + $0x2]]  ;;  %v226_v21 = vstv %s920_s22 }
  0x41   : > { %v233_v17 = vstv %s601_s24  ;;  %s607_s30 = sld [smem:[#allocation2 + $0x6]] }
  0x42   : > { %v220_v18 = vadd.f32 %v219_v13, %v216_v15  ;;  %v234_v19 = vmul.f32 %v233_v17, %v203_v4  ;;  %v236_v20 = vstv %s602_s25  ;;  %s608_s3 = sld [smem:[#allocation2 + $0xa]] }
  0x43   : > { %v237_v22 = vmul.f32 %v594_v5, %v236_v20  ;;  %v240_v23 = vstv %s603_s26  ;;  %s609_s4 = sld [smem:[#allocation2 + $0xe]] }
  0x44   : > { %v224_v24 = vadd.f32 %v223_v16, %v220_v18  ;;  %v241_v25 = vmul.f32 %v595_v6, %v240_v23  ;;  %v244_v26 = vstv %s604_s27  ;;  %s928_s5 = sld [smem:[#allocation2 + $0x12]] }
  0x45   : > { %v238_v27 = vadd.f32 %v237_v22, %v234_v19  ;;  %v245_v28 = vmul.f32 %v922_v8, %v244_v26  ;;  %s611_s6 = sld [smem:[#allocation2 + $0x3]]  ;;  %v248_v35 = vstv %s924_s28 }
  0x46   : > { %v227_v29 = vadd.f32 %v226_v21, %v224_v24  ;;  %v255_v30 = vstv %s606_s29  ;;  %s612_s8 = sld [smem:[#allocation2 + $0x7]] }
  0x47   : > { %v242_v31 = vadd.f32 %v241_v25, %v238_v27  ;;  %v256_v32 = vmul.f32 %v255_v30, %v203_v4  ;;  %v258_v33 = vstv %s607_s30  ;;  %s613_s14 = sld [smem:[#allocation2 + $0xb]] }
  0x48   : > { %v228_v34 = vmul.f32 0.5, %v227_v29  ;;  %v259_v36 = vmul.f32 %v594_v5, %v258_v33  ;;  %v262_v37 = vstv %s608_s3  ;;  %s614_s16 = sld [smem:[#allocation2 + $0xf]] }
  0x49   : > { %v246_v38 = vadd.f32 %v245_v28, %v242_v31  ;;  %v263_v39 = vmul.f32 %v595_v6, %v262_v37  ;;  %v266_v40 = vstv %s609_s4  ;;  %s615_s17 = sld [smem:[#allocation2 + $0x13]] }
  0x4a   : > { %715 = vtanh.f32 %v228_v34  ;;  %v260_v41 = vadd.f32 %v259_v36, %v256_v32  ;;  %v267_v42 = vmul.f32 %v922_v8, %v266_v40  ;;  %v270_v49 = vstv %s928_s5  ;;  %s935_s19 = sld [smem:[#allocation2 + $0x14]] }
  0x4b   : > { %v249_v43 = vadd.f32 %v248_v35, %v246_v38  ;;  %v277_v44 = vstv %s611_s6  ;;  %s937_s23 = sld [smem:[#allocation2 + $0x18]] }
  0x4c   : > { %v264_v45 = vadd.f32 %v263_v39, %v260_v41  ;;  %v278_v46 = vmul.f32 %v277_v44, %v203_v4  ;;  %v280_v47 = vstv %s612_s8  ;;  %s939_s22 = sld [smem:[#allocation2 + $0x1c]] }
  0x4d   : > { %v250_v48 = vmul.f32 0.5, %v249_v43  ;;  %v281_v50 = vmul.f32 %v594_v5, %v280_v47  ;;  %v284_v51 = vstv %s613_s14  ;;  %s941_s24 = sld [smem:[#allocation2 + $0x15]] }
  0x4e   : > { %v268_v52 = vadd.f32 %v267_v42, %v264_v45  ;;  %v285_v53 = vmul.f32 %v595_v6, %v284_v51  ;;  %v288_v54 = vstv %s614_s16  ;;  %s943_s25 = sld [smem:[#allocation2 + $0x19]] }
  0x4f   : > { %717 = vtanh.f32 %v250_v48  ;;  %v282_v55 = vadd.f32 %v281_v50, %v278_v46  ;;  %v289_v56 = vmul.f32 %v922_v8, %v288_v54  ;;  %v292_v60 = vstv %s615_s17  ;;  %s626_s26 = sld [smem:[#allocation2 + $0x16]] }
  0x50   : > { %v271_v57 = vadd.f32 %v270_v49, %v268_v52  ;;  %s945_s27 = sld [smem:[#allocation2 + $0x1a]]  ;;  %v299_v4 = vstv %s935_s19 }
  0x51   : > { %v286_v58 = vadd.f32 %v285_v53, %v282_v55  ;;  %s947_s28 = sld [smem:[#allocation2 + $0x1d]]  ;;  %v302_v8 = vstv %s937_s23 }
  0x52   : > { %v272_v59 = vmul.f32 0.5, %v271_v57  ;;  %s949_s29 = sld [smem:[#allocation2 + $0x1e]]  ;;  %v306_v24 = vstv %s939_s22 }
  0x53   : > { %v290_v61 = vadd.f32 %v289_v56, %v286_v58  ;;  %s631_s30 = sld [smem:[#allocation2 + $0x17]]  ;;  %v321_v6 = vstv %s941_s24 }
  0x54   : > { %719 = vtanh.f32 %v272_v59  ;;  %s632_s3 = sld [smem:[#allocation2 + $0x1b]]  ;;  %v324_v9 = vstv %s943_s25 }
  0x55   : > { %v293_v62 = vadd.f32 %v292_v60, %v290_v61  ;;  %s951_s4 = sld [smem:[#allocation2 + $0x1f]]  ;;  %v343_v7 = vstv %s626_s26 }
  0x56   : > { %s954_s5 = sld [smem:[#allocation2 + $0x20]]  ;;  %v346_v10 = vstv %s945_s27 }
  0x57   : > { %v716_v63 = vpop.eup %715  ;;  %v294_v0 = vmul.f32 0.5, %v293_v62  ;;  %s959_s6 = sld [smem:[#allocation2 + $0x21]]  ;;  %v328_v25 = vstv %s947_s28 }
  0x58   : > { %v230_v1 = vmul.f32 0.5, %v716_v63  ;;  %s962_s8 = sld [smem:[#allocation2 + $0x22]]  ;;  %v350_v26 = vstv %s949_s29 }
  0x59   : > { %721 = vtanh.f32 %v294_v0  ;;  %v365_v13 = vstv %s631_s30  ;;  %s964_s14 = sld [smem:[#allocation2 + $0x23]] }
  0x5a   : > { %v231_v2 = vadd.f32 0.5, %v230_v1  ;;  %v368_v17 = vstv %s632_s3  ;;  %s966_s16 = sld [smem:[#allocation2 + $0x24]] }
  0x5b   : > { %s968_s17 = sld [smem:[#allocation2 + $0x25]]  ;;  %v372_v27 = vstv %s951_s4 }
  0x5c   : > { %v718_v3 = vpop.eup %717  ;;  %v300_v12 = vmul.f32 %v299_v4, %v231_v2  ;;  %v322_v14 = vmul.f32 %v321_v6, %v231_v2  ;;  %v344_v15 = vmul.f32 %v343_v7, %v231_v2  ;;  %v366_v16 = vmul.f32 %v365_v13, %v231_v2  ;;  %s973_s19 = sld [smem:[#allocation2 + $0x26]] }
  0x5d   : > { %v252_v5 = vmul.f32 0.5, %v718_v3  ;;  %s976_s23 = sld [smem:[#allocation2 + $0x27]]  ;;  %v310_v39 = vstv %s954_s5  ;;  %v332_v41 = vstv %s959_s6 }
  0x5e   : > { %v354_v42 = vstv %s962_s8  ;;  %s986_s22 = sld [smem:[#allocation2 + $0x28]] }
  0x5f   : > { %v253_v11 = vadd.f32 0.5, %v252_v5  ;;  %v376_v43 = vstv %s964_s14  ;;  %s988_s24 = sld [smem:[#allocation2 + $0x2c]] }
  0x60   : > { %v314_v52 = vstv %s966_s16  ;;  %s990_s25 = sld [smem:[#allocation2 + $0x30]] }
  0x61   : > { %v720_v18 = vpop.eup %719  ;;  %v303_v19 = vmul.f32 %v302_v8, %v253_v11  ;;  %v325_v20 = vmul.f32 %v324_v9, %v253_v11  ;;  %v347_v21 = vmul.f32 %v346_v10, %v253_v11  ;;  %v369_v22 = vmul.f32 %v368_v17, %v253_v11  ;;  %s992_s26 = sld [smem:[#allocation2 + $0x34]] }
  0x62   : > { %v274_v23 = vmul.f32 0.5, %v720_v18  ;;  %v336_v53 = vstv %s968_s17  ;;  %v358_v54 = vstv %s973_s19  ;;  %s994_s27 = sld [smem:[#allocation2 + $0x29]] }
  0x63   : > { %v304_v29 = vadd.f32 %v303_v19, %v300_v12  ;;  %v326_v30 = vadd.f32 %v325_v20, %v322_v14  ;;  %v348_v31 = vadd.f32 %v347_v21, %v344_v15  ;;  %v370_v32 = vadd.f32 %v369_v22, %v366_v16  ;;  %s996_s28 = sld [smem:[#allocation2 + $0x2d]] }
  0x64   : > { %v275_v28 = vadd.f32 0.5, %v274_v23  ;;  %v380_v55 = vstv %s976_s23  ;;  %s998_s29 = sld [smem:[#allocation2 + $0x31]]  ;;  %v387_v4 = vstv %s986_s22 }
  0x65   : > { %s1000_s30 = sld [smem:[#allocation2 + $0x35]]  ;;  %v390_v5 = vstv %s988_s24 }
  0x66   : > { %v722_v33 = vpop.eup %721  ;;  %v307_v34 = vmul.f32 %v306_v24, %v275_v28  ;;  %v329_v35 = vmul.f32 %v328_v25, %v275_v28  ;;  %v351_v36 = vmul.f32 %v350_v26, %v275_v28  ;;  %v373_v37 = vmul.f32 %v372_v27, %v275_v28  ;;  %s1002_s3 = sld [smem:[#allocation2 + $0x2a]] }
  0x67   : > { %v296_v38 = vmul.f32 0.5, %v722_v33  ;;  %s1004_s4 = sld [smem:[#allocation2 + $0x2e]]  ;;  %v394_v7 = vstv %s990_s25  ;;  %v398_v8 = vstv %s992_s26 }
  0x68   : > { %v308_v40 = vadd.f32 %v307_v34, %v304_v29  ;;  %v330_v45 = vadd.f32 %v329_v35, %v326_v30  ;;  %v352_v46 = vadd.f32 %v351_v36, %v348_v31  ;;  %v374_v47 = vadd.f32 %v373_v37, %v370_v32  ;;  %s1006_s5 = sld [smem:[#allocation2 + $0x32]] }
  0x69   : > { %v297_v44 = vadd.f32 0.5, %v296_v38  ;;  %s1008_s6 = sld [smem:[#allocation2 + $0x36]]  ;;  %v409_v9 = vstv %s994_s27  ;;  %v412_v10 = vstv %s996_s28 }
  0x6a   : > { %s1010_s8 = sld [smem:[#allocation2 + $0x2b]]  ;;  %v416_v13 = vstv %s998_s29 }
  0x6b   : > { %v311_v48 = vmul.f32 %v310_v39, %v297_v44  ;;  %v333_v49 = vmul.f32 %v332_v41, %v297_v44  ;;  %v355_v50 = vmul.f32 %v354_v42, %v297_v44  ;;  %v377_v51 = vmul.f32 %v376_v43, %v297_v44  ;;  %s1012_s14 = sld [smem:[#allocation2 + $0x2f]] }
  0x6c   : > { %s1014_s16 = sld [smem:[#allocation2 + $0x33]]  ;;  %v420_v14 = vstv %s1000_s30  ;;  %v431_v15 = vstv %s1002_s3  ;;  %s593_s30 = sshll.u32 %s917_s7, 3 }
  0x6d   : > { %v312_v56 = vadd.f32 %v311_v48, %v308_v40  ;;  %v334_v57 = vadd.f32 %v333_v49, %v330_v45  ;;  %v356_v58 = vadd.f32 %v355_v50, %v352_v46  ;;  %v378_v59 = vadd.f32 %v377_v51, %v374_v47  ;;  %s1016_s17 = sld [smem:[#allocation2 + $0x37]]  ;;  %s662_s3 = sshll.u32 %s858_s13, 7 }
  0x6e   : > { %s1027_s19 = sld [smem:[#allocation2 + $0x38]]  ;;  %v434_v18 = vstv %s1004_s4  ;;  %v438_v19 = vstv %s1006_s5  ;;  %s202_s4 = scalar_lea.vmem [#allocation6], %s593_s30 }
  0x6f   : > { %v315_v60 = vadd.f32 %v314_v52, %v312_v56  ;;  %v337_v61 = vadd.f32 %v336_v53, %v334_v57  ;;  %v359_v62 = vadd.f32 %v358_v54, %v356_v58  ;;  %v381_v63 = vadd.f32 %v380_v55, %v378_v59  ;;  %s1032_s23 = sld [smem:[#allocation2 + $0x39]]  ;;  %s507_s5 = sshll.u32 %s202_s4, 4  ;;  %s508_s5 = int_to_ptr.vmem [resolvable:$true] %s507_s5 }
  0x70   : > { %v442_v20 = vstv %s1008_s6  ;;  %v453_v24 = vstv %s1010_s8  ;;  %s1036_s22 = sld [smem:[#allocation2 + $0x3a]] }
  0x71   : > { %v316_v0 = vmul.f32 0.5, %v315_v60  ;;  %v338_v1 = vmul.f32 0.5, %v337_v61  ;;  %v360_v2 = vmul.f32 0.5, %v359_v62  ;;  %v382_v3 = vmul.f32 0.5, %v381_v63  ;;  %s1040_s24 = sld [smem:[#allocation2 + $0x3b]] }
  0x72   : > { %v456_v25 = vstv %s1012_s14  ;;  %v460_v28 = vstv %s1014_s16  ;;  %s656_s25 = sld [smem:[#allocation2 + $0x3c]]  ;;  %s505_s14 = scalar_lea.hbm %s1083_s2, %s662_s3 }
  0x73   : > { %723 = vtanh.f32 %v316_v0  ;;  %v464_v29 = vstv %s1016_s17  ;;  %s657_s26 = sld [smem:[#allocation2 + $0x3d]]  ;;  %s494_s16 = scalar_lea.sflag [#allocation3], %s917_s7 }
  0x74   : > { %725 = vtanh.f32 %v338_v1  ;;  %v402_v51 = vstv %s1027_s19  ;;  %s658_s27 = sld [smem:[#allocation2 + $0x3e]]  ;;  %s754_s17 = scalar_lea.vmem %s508_s5, 128 }
  0x75   : > { %727 = vtanh.f32 %v360_v2  ;;  %v424_v53 = vstv %s1032_s23  ;;  %s659_s28 = sld [smem:[#allocation2 + $0x3f]]  ;;  %p755_p5 = scmp.ne.s32.totalorder %s508_s5, %s754_s17 }
  0x76   : > { %729 = vtanh.f32 %v382_v3  ;;  %v446_v59 = vstv %s1036_s22  ;;  %s660_s29 = sld [smem:[#allocation2 + $0x40]]  ;;  %s821_s19 = smov [#allocation6]  }
  0x77   : > { %v468_v0 = vstv %s1040_s24  ;;  %p756_p10 = pnand %p755_p5, %p1089_p6  ;;  %s758_s23 = sshll.u32 %s821_s19, 4  ;;  %s759_s23 = int_to_ptr.vmem [resolvable:$false] %s758_s23 }
  0x78   : > { %s760_s13 = scalar_lea.vmem %s759_s23, 256  ;;  %p761_p12 = scmp.lt.s32.totalorder %s508_s5, %s759_s23 }
  0x79   : > { %p757_p11 = pneg %p756_p10  ;;  %p762_p13 = scmp.lt.s32.totalorder %s760_s13, %s754_s17 }
  0x7b   : > { %p763_p0 = por %p762_p13, %p761_p12 }
  0x7d   : > { %p764_p1 = pnand %p763_p0, %p757_p11 }
  0x80   : > { %v724_v6 = vpop.eup %723 }
  0x81   : > { %v726_v11 = vpop.eup %725  ;;  %v318_v12 = vmul.f32 0.5, %v724_v6 }
  0x82   : > { %v728_v16 = vpop.eup %727  ;;  %v340_v17 = vmul.f32 0.5, %v726_v11 }
  0x83   : > { %v730_v21 = vpop.eup %729  ;;  %v319_v22 = vadd.f32 0.5, %v318_v12  ;;  %v362_v23 = vmul.f32 0.5, %v728_v16 }
  0x84   : > { %v341_v26 = vadd.f32 0.5, %v340_v17  ;;  %v384_v27 = vmul.f32 0.5, %v730_v21  ;;  %v478_v17 = vstv %s657_s26 }
  0x85   : > { %v363_v30 = vadd.f32 0.5, %v362_v23  ;;  %v388_v31 = vmul.f32 %v387_v4, %v319_v22  ;;  %v410_v32 = vmul.f32 %v409_v9, %v319_v22  ;;  %v432_v33 = vmul.f32 %v431_v15, %v319_v22 }
  0x86   : > { %v385_v34 = vadd.f32 0.5, %v384_v27  ;;  %v391_v35 = vmul.f32 %v390_v5, %v341_v26  ;;  %v413_v36 = vmul.f32 %v412_v10, %v341_v26  ;;  %v435_v37 = vmul.f32 %v434_v18, %v341_v26 }
  0x87   : > { %v395_v38 = vmul.f32 %v394_v7, %v363_v30  ;;  %v417_v39 = vmul.f32 %v416_v13, %v363_v30  ;;  %v439_v40 = vmul.f32 %v438_v19, %v363_v30  ;;  %v454_v41 = vmul.f32 %v453_v24, %v319_v22 }
  0x88   : > { %v392_v42 = vadd.f32 %v391_v35, %v388_v31  ;;  %v399_v43 = vmul.f32 %v398_v8, %v385_v34  ;;  %v414_v44 = vadd.f32 %v413_v36, %v410_v32  ;;  %v421_v45 = vmul.f32 %v420_v14, %v385_v34 }
  0x89   : > { %v436_v46 = vadd.f32 %v435_v37, %v432_v33  ;;  %v443_v47 = vmul.f32 %v442_v20, %v385_v34  ;;  %v457_v48 = vmul.f32 %v456_v25, %v341_v26  ;;  %v461_v49 = vmul.f32 %v460_v28, %v363_v30 }
  0x8a   : > { %v396_v50 = vadd.f32 %v395_v38, %v392_v42  ;;  %v418_v52 = vadd.f32 %v417_v39, %v414_v44  ;;  %v465_v56 = vmul.f32 %v464_v29, %v385_v34  ;;  %v475_v13 = vstv %s656_s25 }
  0x8b   : > { %v440_v54 = vadd.f32 %v439_v40, %v436_v46  ;;  %v458_v55 = vadd.f32 %v457_v48, %v454_v41  ;;  %v482_v20 = vstv %s658_s27  ;;  %v486_v23 = vstv %s659_s28 }
  0x8c   : > { %v400_v57 = vadd.f32 %v399_v43, %v396_v50  ;;  %v422_v58 = vadd.f32 %v421_v45, %v418_v52  ;;  %v490_v30 = vstv %s660_s29 }
  0x8d   : > { %v444_v60 = vadd.f32 %v443_v47, %v440_v54  ;;  %v462_v61 = vadd.f32 %v461_v49, %v458_v55 }
  0x8e   : > { %v403_v62 = vadd.f32 %v402_v51, %v400_v57  ;;  %v425_v63 = vadd.f32 %v424_v53, %v422_v58 }
  0x8f   : > { %v447_v1 = vadd.f32 %v446_v59, %v444_v60  ;;  %v466_v2 = vadd.f32 %v465_v56, %v462_v61 }
  0x90   : > { %v404_v3 = vmul.f32 0.5, %v403_v62  ;;  %v426_v4 = vmul.f32 0.5, %v425_v63 }
  0x91   : > { %v448_v5 = vmul.f32 0.5, %v447_v1  ;;  %v469_v6 = vadd.f32 %v468_v0, %v466_v2 }
  0x92   : > { %731 = vtanh.f32 %v404_v3 }
  0x93   : > { %733 = vtanh.f32 %v426_v4  ;;  %v470_v7 = vmul.f32 0.5, %v469_v6 }
  0x94   : > { %735 = vtanh.f32 %v448_v5 }
  0x95   : > { %737 = vtanh.f32 %v470_v7 }
  0x9f   : > { %v732_v8 = vpop.eup %731 }
  0xa0   : > { %v734_v9 = vpop.eup %733  ;;  %v406_v10 = vmul.f32 0.5, %v732_v8 }
  0xa1   : > { %v736_v11 = vpop.eup %735  ;;  %v428_v12 = vmul.f32 0.5, %v734_v9 }
  0xa2   : > { %v738_v14 = vpop.eup %737  ;;  %v407_v15 = vadd.f32 0.5, %v406_v10  ;;  %v450_v16 = vmul.f32 0.5, %v736_v11 }
  0xa3   : > { %v429_v18 = vadd.f32 0.5, %v428_v12  ;;  %v472_v19 = vmul.f32 0.5, %v738_v14 }
  0xa4   : > { %v451_v21 = vadd.f32 0.5, %v450_v16  ;;  %v476_v22 = vmul.f32 %v475_v13, %v407_v15 }
  0xa5   : > { %v473_v24 = vadd.f32 0.5, %v472_v19  ;;  %v479_v25 = vmul.f32 %v478_v17, %v429_v18 }
  0xa6   : > { %v483_v26 = vmul.f32 %v482_v20, %v451_v21 }
  0xa7   : > { %v480_v27 = vadd.f32 %v479_v25, %v476_v22  ;;  %v487_v28 = vmul.f32 %v486_v23, %v473_v24 }
  0xa9   : > { %v484_v29 = vadd.f32 %v483_v26, %v480_v27 }
  0xab   : > { %v488_v31 = vadd.f32 %v487_v28, %v484_v29 }
  0xad   : > { %v491_v32 = vadd.f32 %v490_v30, %v488_v31 }
  0xaf   : > { %492 = vst [vmem:[%s202_s4] sm:$0xff] %v491_v32 }
  0xb0   : > { %767 = shalt.err (!%p764_p1)
}
  0xb1   : > { %s768_s22 = scalar_lea.hbm %s505_s14, 128  ;;  %s772_s25 = scalar_lea.hbm %s1083_s2, 384 }
  0xb2   : > { %p769_p2 = scmp.ne.s32.totalorder %s505_s14, %s768_s22  ;;  %p773_p7 = scmp.lt.s32.totalorder %s505_s14, %s1083_s2 }
  0xb3   : > { %p774_p8 = scmp.lt.s32.totalorder %s772_s25, %s768_s22 }
  0xb4   : > { %p770_p3 = pnand %p769_p2, %p1089_p6 }
  0xb5   : > { %p775_p9 = por %p774_p8, %p773_p7 }
  0xb6   : > { %p771_p4 = pneg %p770_p3 }
  0xb8   : > { %p776_p5 = pnand %p775_p9, %p771_p4 }
  0xba   : > { %779 = shalt.err (!%p776_p5)
}
  0xbb   : > { %669 = dma.vmem_to_hbm [thread:$0]  (%p1089_p6), %s508_s5, 128, %s505_s14, %s494_s16  }
  0xbc PF: > { %p681_p10 = scmp.ge.s32.totalorder %s818_s12, 2  ;;  %s519_s28 = sand.u32 1, %s806_s9  }
  0xbd   : > { %p1090_p11 = scmp.ne.s32.totalorder %s1087_s21, 0  ;;  %s520_s29 = scalar_lea.sflag [#allocation3], %s519_s28 }
  0xbf   : > { %p676_p12 = pnand %p681_p10, %p1090_p11 }
  0xc1   : > { %p677_p13 = pneg %p676_p12 }
  0xc3   : > { %801 = dma.done.wait (%p677_p13), %s520_s29, 128  }
  0xc4   : > { %803 = vsyncadd (%p677_p13), %s520_s29, 4294967168  ;;  %p13_p0 = scmp.ge.s32.totalorder %s862_s15, 5   ;;  %s1091_s9 = smov %s810_s10 }
  0xc5   : > { %s1092_s10 = smov %s814_s11  ;;  %s1093_s11 = smov %s874_s18 }
  0xc6   : > { %s1094_s12 = smov %s862_s15  ;;  %15 = sbr.rel (!%p13_p0) target bundleno = 4 (0x4), region = 114 }
  0xcb   :  { %525 = vsyncpa [#allocation3], 1 }
  0xcc   :  { %527 = vsyncpa [#allocation3 + $0x1], 1 }
  0xcd   :  { %528 = vsyncpa [#allocation4], 1 }
  0xce   :  { %530 = vsyncpa [#allocation4 + $0x1], 1 }

</bundles_post_ra>
